<compile_context>
chip_gen: v7x
topology: tpu7x:2x2x1
jax: 0.10.0
libtpu: 0.0.40
codegen_flags: <defaults>
</compile_context>

<pallas_src>
import functools

import jax
import jax.numpy as jnp
from jax import lax
from jax.experimental import pallas as pl
from jax.experimental.pallas import tpu as pltpu


def _bc_linear_kernel(x_ref, w_ref, o_ref):
    # x_ref: (tm, in_features)   VMEM tile (streamed per batch step)
    # w_ref: (tn, in_features)   VMEM tile (resident across batch steps)
    # o_ref: (tm, tn)            VMEM tile (lane-dense, streamed out)
    o_ref[...] = lax.dot_general(
        x_ref[...],
        w_ref[...],
        dimension_numbers=(((1,), (1,)), ((), ())),  # contract on in_features
        preferred_element_type=jnp.float32,
    ).astype(o_ref.dtype)


@functools.partial(jax.jit, static_argnames=("block_m", "vmem_budget_bytes"))
def bc_model_forward(x, weight, *, block_m=None, vmem_budget_bytes=32 * 1024 * 1024):
    """Forward pass of BCModel.

    Args:
      x:      (B, in_features) float32
      weight: (num_classes, in_features) float32  -- PyTorch nn.Linear layout.

    Returns:
      (B, 2, num_classes // 2) float32
    """
    B, in_features = x.shape
    num_classes, in_features_w = weight.shape
    assert in_features == in_features_w
    assert num_classes % 2 == 0

    # ---- Lane-dense output: pad the class dim up to a multiple of 128 by
    # zero-padding the weight's out dim (extra columns are exactly zero and
    # are sliced off below).
    c_pad = max(128, ((num_classes + 127) // 128) * 128)
    if c_pad != num_classes:
        weight_p = jnp.pad(weight, ((0, c_pad - num_classes), (0, 0)))
    else:
        weight_p = weight

    budget = int(vmem_budget_bytes * 0.75)  # leave headroom for Mosaic scratch

    # ---- Class-dim tile (tn): keep the whole (padded) class dim resident if
    # its double-buffered footprint fits half the budget; otherwise tile it in
    # multiples of 128.
    w_row_bytes = in_features * 4
    tn = c_pad
    if 2 * tn * w_row_bytes > budget // 2:
        tn = max(128, ((budget // 2) // (2 * w_row_bytes)) // 128 * 128)
        tn = min(tn, c_pad)
    # Make c_pad an exact multiple of tn (extra zero columns, sliced off later).
    n_blocks_n = pl.cdiv(c_pad, tn)
    c_full = n_blocks_n * tn
    if c_full != c_pad:
        weight_p = jnp.pad(weight_p, ((0, c_full - c_pad), (0, 0)))

    # ---- Batch tile (tm) from the remaining budget:
    #   2 * tm*in_features*4   (double-buffered x tile)
    # + 2 * tn*in_features*4   (weight tile, double-buffered worst case)
    # + 2 * tm*tn*4            (double-buffered out tile)
    if block_m is None:
        remaining = budget - 2 * tn * w_row_bytes
        per_row = 2 * in_features * 4 + 2 * tn * 4
        tm = max(8, remaining // max(per_row, 1))
        tm = min(int(tm), 1024)          # diminishing returns past ~1K rows
        tm = (tm // 8) * 8               # f32 sublane alignment
        tm = max(tm, 8)
    else:
        tm = block_m
        assert tm % 8 == 0, "block_m must be a multiple of 8 (f32 sublane)"

    # Pad batch so it is a multiple of 8, cap tm at the padded batch, then pad
    # further so every grid block is full (no partial-block masking needed).
    b_pad8 = ((B + 7) // 8) * 8
    tm = min(tm, b_pad8)
    n_blocks_m = pl.cdiv(b_pad8, tm)
    b_full = n_blocks_m * tm
    if b_full != B:
        x_p = jnp.pad(x, ((0, b_full - B), (0, 0)))
    else:
        x_p = x

    flops = 2 * b_full * in_features * c_full
    bytes_accessed = 4 * (b_full * in_features + c_full * in_features + b_full * c_full)

    # Grid = (class tiles, batch tiles): batch is innermost so each weight
    # tile is reused across every batch tile (resident when n_blocks_n == 1).
    out = pl.pallas_call(
        _bc_linear_kernel,
        out_shape=jax.ShapeDtypeStruct((b_full, c_full), jnp.float32),
        grid_spec=pltpu.PrefetchScalarGridSpec(
            num_scalar_prefetch=0,
            grid=(n_blocks_n, n_blocks_m),
            in_specs=[
                pl.BlockSpec((tm, in_features), lambda j, i: (i, 0)),
                pl.BlockSpec((tn, in_features), lambda j, i: (j, 0)),
            ],
            out_specs=pl.BlockSpec((tm, tn), lambda j, i: (i, j)),
        ),
        compiler_params=pltpu.CompilerParams(
            dimension_semantics=("parallel", "parallel"),
            vmem_limit_bytes=vmem_budget_bytes,
        ),
        cost_estimate=pl.CostEstimate(
            flops=flops, transcendentals=0, bytes_accessed=bytes_accessed
        ),
    )(x_p, weight_p)

    # Strip batch/class padding, then out.view(B, 2, -1).
    out = out[:B, :num_classes]
    return out.reshape(B, 2, num_classes // 2)


if __name__ == "__main__":
    # Small shapes consistent with the module: batch=8, in_features=32,
    # num_classes=8 (must be even so the (B, 2, -1) view is valid).
    B = 8
    in_features = 32
    num_classes = 8

    key = jax.random.PRNGKey(0)
    kx, kw = jax.random.split(key)

    x = jax.random.normal(kx, (B, in_features), dtype=jnp.float32)
    # Deterministic synthetic weight in nn.Linear layout (out, in).
    weight = jax.random.normal(kw, (num_classes, in_features), dtype=jnp.float32) * 0.1

    out = bc_model_forward(x, weight)
    out = jax.block_until_ready(out)

    # Correctness check against plain JAX reference of the PyTorch semantics.
    ref = (x @ weight.T).reshape(B, 2, num_classes // 2)
    assert out.shape == (B, 2, num_classes // 2)
    assert jnp.allclose(out, ref, atol=1e-4, rtol=1e-4), (
        jnp.max(jnp.abs(out - ref))
    )

    print("KERNEL_OK")
</pallas_src>

<mosaic_0001>
module attributes {stable_mosaic.version = 11 : i64} {
  func.func @_bc_linear_kernel(%arg0: i32, %arg1: i32, %arg2: memref<8x32xf32, #tpu.memory_space<vmem>>, %arg3: memref<128x32xf32, #tpu.memory_space<vmem>>, %arg4: memref<8x128xf32, #tpu.memory_space<vmem>>) attributes {dimension_semantics = [#tpu.dimension_semantics<parallel>, #tpu.dimension_semantics<parallel>], iteration_bounds = array<i64: 1, 1>, scalar_prefetch = 0 : i64, scratch_operands = 0 : i64, tpu.core_type = #tpu.core_type<tc>, window_params = [{transform_indices = @transform_0, window_bounds = array<i64: 8, 32>}, {transform_indices = @transform_1, window_bounds = array<i64: 128, 32>}, {transform_indices = @transform_2, window_bounds = array<i64: 8, 128>}]} {
    %c0 = arith.constant 0 : index
    %c0_0 = arith.constant 0 : index
    %0 = vector.load %arg2[%c0, %c0_0] : memref<8x32xf32, #tpu.memory_space<vmem>>, vector<8x32xf32>
    %c0_1 = arith.constant 0 : index
    %c0_2 = arith.constant 0 : index
    %1 = vector.load %arg3[%c0_1, %c0_2] : memref<128x32xf32, #tpu.memory_space<vmem>>, vector<128x32xf32>
    %cst = arith.constant dense<0.000000e+00> : vector<8x128xf32>
    %2 = tpu.matmul %0, %1, %cst {dimension_numbers = #tpu.dot_dimension_numbers<[1], [1], [0], [0], [0, 0, 1, 0], [], []>} : vector<8x32xf32>, vector<128x32xf32>, vector<8x128xf32> -> vector<8x128xf32>
    %c0_3 = arith.constant 0 : index
    %c0_4 = arith.constant 0 : index
    %3 = vector.load %arg4[%c0_3, %c0_4] : memref<8x128xf32, #tpu.memory_space<vmem>>, vector<8x128xf32>
    tpu.vector_store %arg4[%c0_3, %c0_4], %2 {strides = array<i32>} : memref<8x128xf32, #tpu.memory_space<vmem>>, vector<8x128xf32>,
    return
  }
  func.func @transform_0(%arg0: i32, %arg1: i32) -> (i32, i32) {
    %c0_i32 = arith.constant 0 : i32
    %c0_i32_0 = arith.constant 0 : i32
    return %arg1, %c0_i32 : i32, i32
  }
  func.func @transform_1(%arg0: i32, %arg1: i32) -> (i32, i32) {
    %c0_i32 = arith.constant 0 : i32
    %c0_i32_0 = arith.constant 0 : i32
    return %arg0, %c0_i32 : i32, i32
  }
  func.func @transform_2(%arg0: i32, %arg1: i32) -> (i32, i32) {
    %c0_i32 = arith.constant 0 : i32
    return %arg1, %arg0 : i32, i32
  }
}

</mosaic_0001>

<bundles_post_ra>
// kernel: bc_model_forward.1
= control target key start
LH: loop header
LB: loop body
LE: loop exit
PB: predicated region body
PF: predicated region fallthrough
CT: control target
= control target key end

     0   :  { %vm28_vm0 = vcmask 261120   ;;  %v259_v0 = vmov 0.0|0.0   ;;  %vm260_vm2 = vmmov 0   ;;  %v261_v4 = vmov 0.0   ;;  %s354_s1 = inlined_call_operand.vmem [shape: f32[128,32], index: 1, kind: input, shape index: {}]   ;;  %s355_s0 = inlined_call_operand.vmem [shape: f32[8,32], index: 0, kind: input, shape index: {}]   ;;  %s356_s2 = inlined_call_operand.vmem [shape: f32[8,128], index: 2, kind: output, shape index: {}]  }
   0x1   :  { %224 = vmatprep.subr.bf16.mxu0 %v259_v0  ;;  %v12_v1 = vld [vmem:[%s354_s1] sm:$0xff]  ;;  %v13_v2 = vld [vmem:[%s354_s1 + $0x8] sm:$0xff]  ;;  %vm285_vm1 = vmpackc.low %vm28_vm0, %vm28_vm0  ;;  %221 = vmatprep.mubr.msk.f32.mxu0 %vm260_vm2, %v261_v4 }
   0x2   :  { %v225_v5 = vpack.c.bf16 %v13_v2, %v12_v1  ;;  %v14_v6 = vld [vmem:[%s354_s1 + $0x10] sm:$0xff]  ;;  %v15_v7 = vld [vmem:[%s354_s1 + $0x18] sm:$0xff]  ;;  %v16_v9 = vld [vmem:[%s354_s1 + $0x20] sm:$0xff] }
   0x3   :  { %v229_v8 = vpack.c.bf16 %v15_v7, %v14_v6  ;;  %v17_v10 = vld [vmem:[%s354_s1 + $0x28] sm:$0xff]  ;;  %v18_v12 = vld [vmem:[%s354_s1 + $0x30] sm:$0xff]  ;;  %v19_v13 = vld [vmem:[%s354_s1 + $0x38] sm:$0xff] }
   0x4   :  { %227 = vmatpush3.bf16.xpose.msk.msra.mxu0 %vm285_vm1, %v225_v5  ;;  %v233_v11 = vpack.c.bf16 %v17_v10, %v16_v9  ;;  %v237_v14 = vpack.c.bf16 %v19_v13, %v18_v12  ;;  %v20_v15 = vld [vmem:[%s354_s1 + $0x40] sm:$0xff]  ;;  %v21_v16 = vld [vmem:[%s354_s1 + $0x48] sm:$0xff]  ;;  %v22_v18 = vld [vmem:[%s354_s1 + $0x50] sm:$0xff] }
   0x5   :  { %228 = vmatprep.subr.bf16.mxu0 %v259_v0  ;;  %v241_v17 = vpack.c.bf16 %v21_v16, %v20_v15  ;;  %v23_v19 = vld [vmem:[%s354_s1 + $0x58] sm:$0xff]  ;;  %v24_v21 = vld [vmem:[%s354_s1 + $0x60] sm:$0xff]  ;;  %v25_v22 = vld [vmem:[%s354_s1 + $0x68] sm:$0xff] }
   0x6   :  { %v245_v20 = vpack.c.bf16 %v23_v19, %v22_v18  ;;  %v249_v23 = vpack.c.bf16 %v25_v22, %v24_v21  ;;  %v26_v24 = vld [vmem:[%s354_s1 + $0x70] sm:$0xff]  ;;  %v27_v25 = vld [vmem:[%s354_s1 + $0x78] sm:$0xff]  ;;  %v11_v27 = vld [vmem:[%s355_s0] sm:$0xff] }
   0x7   :  { %v253_v26 = vpack.c.bf16 %v27_v25, %v26_v24 }
   0xc   :  { %231 = vmatpush3.bf16.xpose.msk.msra.mxu0 %vm285_vm1, %v229_v8 }
   0xd   :  { %232 = vmatprep.subr.bf16.mxu0 %v259_v0 }
  0x14   :  { %235 = vmatpush3.bf16.xpose.msk.msra.mxu0 %vm285_vm1, %v233_v11 }
  0x15   :  { %236 = vmatprep.subr.bf16.mxu0 %v259_v0 }
  0x1c   :  { %239 = vmatpush3.bf16.xpose.msk.msra.mxu0 %vm285_vm1, %v237_v14 }
  0x1d   :  { %240 = vmatprep.subr.bf16.mxu0 %v259_v0 }
  0x24   :  { %243 = vmatpush3.bf16.xpose.msk.msra.mxu0 %vm285_vm1, %v241_v17 }
  0x25   :  { %244 = vmatprep.subr.bf16.mxu0 %v259_v0 }
  0x2c   :  { %247 = vmatpush3.bf16.xpose.msk.msra.mxu0 %vm285_vm1, %v245_v20 }
  0x2d   :  { %248 = vmatprep.subr.bf16.mxu0 %v259_v0 }
  0x34   :  { %251 = vmatpush3.bf16.xpose.msk.msra.mxu0 %vm285_vm1, %v249_v23 }
  0x35   :  { %252 = vmatprep.subr.bf16.mxu0 %v259_v0 }
  0x3c   :  { %255 = vmatpush3.bf16.xpose.msk.msra.mxu0 %vm285_vm1, %v253_v26 }
  0x43   :  { %222 = vmatmul.mubr.msk.f32.vlgmr.msra.gmra.mrb[0].mxu0 %vm28_vm0, %v11_v27 }
 0x116   :  { %v146_v28 = vpop.f32.mrb[0].mxu0 }
 0x117   :  { %150 = vst [vmem:[%s356_s2] sm:$0xff] %v146_v28  ;;  %v223_v29 = vpop.f32.mrb[1].mxu0 }

</bundles_post_ra>
